<compile_context>
chip_gen: v7x
topology: tpu7x:2x2x1
jax: 0.10.0
libtpu: 0.0.40
codegen_flags: <defaults>
</compile_context>

<pallas_src>
import math

import jax
import jax.numpy as jnp
from jax.experimental import pallas as pl
from jax.experimental.pallas import tpu as pltpu

_LANE = 128
_SUBLANE_32BIT = 8
_TARGET_BLOCK_BYTES = 4 << 20            # ~4 MiB per x/out block
_VMEM_LIMIT_BYTES = 40 * 1024 * 1024     # 2x(x) + 2x(pe) + 2x(out) blocks << 40 MiB
_SMALL_INPUT_BYTES = 2 << 20             # below this, fused XLA add beats a kernel launch


def _add_pos_kernel(x_ref, pe_ref, o_ref):
    # x_ref / o_ref: (TB, TD, TL) tile of x; pe_ref: (1, TD, TL) tile of the table.
    # Broadcast add over the batch tile — one vld + broadcast vld + vadd + vst
    # per vreg; the kernel is purely HBM-bandwidth bound.
    o_ref[...] = x_ref[...] + pe_ref[...]


def make_pos_emb(n_dim: int, max_len: int, dtype=jnp.float32) -> jnp.ndarray:
    """Builds the (1, n_dim, max_len) sin/cos table exactly as the torch init."""
    assert n_dim % 2 == 0, "n_dim must be even (matches the torch module's interleave)"
    position = jnp.arange(max_len, dtype=jnp.float32)                     # (max_len,)
    div_term = jnp.exp(
        jnp.arange(0, n_dim, 2, dtype=jnp.float32) * (-math.log(10000.0) / n_dim)
    )                                                                     # (n_dim//2,)
    angles = div_term[:, None] * position[None, :]                        # (n_dim//2, max_len)
    # interleave: even rows = sin, odd rows = cos (matches pe[0, 0::2] / pe[0, 1::2])
    pe = jnp.stack([jnp.sin(angles), jnp.cos(angles)], axis=1).reshape(n_dim, max_len)
    return pe[None].astype(dtype)                                         # (1, n_dim, max_len)


def prepare_pos_emb(pos_emb: jnp.ndarray, seq_len: int, dtype) -> jnp.ndarray:
    """Hoisted once-per-config prep: slice to seq_len and cast. NO flattening/reshape."""
    _, n_dim, max_len = pos_emb.shape
    assert seq_len <= max_len, "seq_len exceeds positional table max_len"
    return pos_emb[:, :, :seq_len].astype(dtype)                          # (1, n_dim, seq_len)


def _pick_blocks(B: int, D: int, L: int, itemsize: int):
    """Choose (TB, TD, TL) for the native (B, D, L) layout.

    Trailing-dim tiles are multiples of (sub, 128) or equal to the full extent
    (the only legal shapes); blocks are capped around _TARGET_BLOCK_BYTES so a
    double-buffered pipeline fits comfortably in VMEM on every generation.
    Ragged tails are handled by a pl.cdiv grid (Pallas masks partial tiles).
    """
    sub = _SUBLANE_32BIT * max(1, 4 // itemsize)      # 8 f32, 16 bf16, 32 int8/fp8
    target = _TARGET_BLOCK_BYTES

    # lanes (last dim): full extent if it fits the budget, else a multiple of 128
    lane_budget = max(_LANE, target // (sub * itemsize))
    tl = L if L <= lane_budget else (lane_budget // _LANE) * _LANE

    # sublanes (second-to-last dim): full extent if it fits, else a multiple of sub
    row_budget = max(sub, target // (tl * itemsize))
    td = D if D <= row_budget else (row_budget // sub) * sub

    # batch (leading dim): no alignment constraint
    tb = max(1, min(B, target // (td * tl * itemsize)))
    return tb, td, tl


def _positional_encoding_pallas(x: jnp.ndarray, pe: jnp.ndarray) -> jnp.ndarray:
    B, D, L = x.shape
    itemsize = jnp.dtype(x.dtype).itemsize
    tb, td, tl = _pick_blocks(B, D, L, itemsize)

    # Grid: (L tiles, D tiles) OUTER, batch INNER -> PE block index is constant
    # across consecutive steps, so the PE tile stays resident (no re-DMA).
    grid = (pl.cdiv(L, tl), pl.cdiv(D, td), pl.cdiv(B, tb))

    return pl.pallas_call(
        _add_pos_kernel,
        out_shape=jax.ShapeDtypeStruct((B, D, L), x.dtype),
        grid=grid,
        in_specs=[
            pl.BlockSpec((tb, td, tl), lambda l, d, b: (b, d, l)),   # x tile
            pl.BlockSpec((1, td, tl), lambda l, d, b: (0, d, l)),    # shared PE tile
        ],
        out_specs=pl.BlockSpec((tb, td, tl), lambda l, d, b: (b, d, l)),
        compiler_params=pltpu.CompilerParams(
            dimension_semantics=("parallel", "parallel", "parallel"),
            vmem_limit_bytes=_VMEM_LIMIT_BYTES,
        ),
    )(x, pe)


def positional_encoding(
    x: jnp.ndarray,
    pe: jnp.ndarray,
    *,
    dropout_p: float = 0.0,
    force_pallas: bool = False,
) -> jnp.ndarray:
    """Forward pass of PositionalEncoding.

    x:  (B, n_dim, seq_len) activations.
    pe: (1, n_dim, seq_len) pre-sliced/cast table (see prepare_pos_emb).
    """
    assert dropout_p == 0.0, "non-zero dropout not implemented"  # TODO(synk): PRNG dropout mask
    B, D, L = x.shape
    assert pe.shape == (1, D, L), f"expected pe shape (1,{D},{L}), got {pe.shape}"

    nbytes = B * D * L * jnp.dtype(x.dtype).itemsize
    if not force_pallas and nbytes < _SMALL_INPUT_BYTES:
        # Tiny input: a fused XLA add is far cheaper than any kernel launch.
        return x + pe
    return _positional_encoding_pallas(x, pe)


if __name__ == "__main__":
    key = jax.random.PRNGKey(0)

    B, D, L = 2, 32, 16          # batch, n_dim, seq_len
    MAX_LEN = 64                 # max_len of the positional table

    x = jax.random.normal(key, (B, D, L), dtype=jnp.float32)
    pos_emb = make_pos_emb(D, MAX_LEN)                 # fixed buffer, built once
    pe = prepare_pos_emb(pos_emb, L, x.dtype)          # hoisted slice + cast

    # Exercise the Pallas path explicitly (the small-input fast path would
    # otherwise bypass the kernel at this tiny test shape).
    out = positional_encoding(x, pe, force_pallas=True)
    out = jax.block_until_ready(out)

    # Also run the default path (fast path for small inputs).
    out_fast = jax.block_until_ready(positional_encoding(x, pe))

    # quick correctness check against the plain-JAX reference
    ref = x + pos_emb[:, :, :L]
    assert out.shape == (B, D, L)
    assert jnp.allclose(out, ref, atol=1e-6), "pallas path mismatch vs reference"
    assert jnp.allclose(out_fast, ref, atol=1e-6), "fast path mismatch vs reference"

    print("KERNEL_OK")
</pallas_src>

<mosaic_0001>
module attributes {stable_mosaic.version = 11 : i64} {
  func.func @_add_pos_kernel(%arg0: i32, %arg1: i32, %arg2: i32, %arg3: memref<2x32x16xf32, #tpu.memory_space<vmem>>, %arg4: memref<1x32x16xf32, #tpu.memory_space<vmem>>, %arg5: memref<2x32x16xf32, #tpu.memory_space<vmem>>) attributes {dimension_semantics = [#tpu.dimension_semantics<parallel>, #tpu.dimension_semantics<parallel>, #tpu.dimension_semantics<parallel>], iteration_bounds = array<i64: 1, 1, 1>, scalar_prefetch = 0 : i64, scratch_operands = 0 : i64, tpu.core_type = #tpu.core_type<tc>, window_params = [{transform_indices = @transform_0, window_bounds = array<i64: 2, 32, 16>}, {transform_indices = @transform_1, window_bounds = array<i64: 1, 32, 16>}, {transform_indices = @transform_2, window_bounds = array<i64: 2, 32, 16>}]} {
    %c0 = arith.constant 0 : index
    %c0_0 = arith.constant 0 : index
    %c0_1 = arith.constant 0 : index
    %0 = vector.load %arg3[%c0, %c0_0, %c0_1] : memref<2x32x16xf32, #tpu.memory_space<vmem>>, vector<2x32x16xf32>
    %c0_2 = arith.constant 0 : index
    %c0_3 = arith.constant 0 : index
    %c0_4 = arith.constant 0 : index
    %1 = vector.load %arg4[%c0_2, %c0_3, %c0_4] : memref<1x32x16xf32, #tpu.memory_space<vmem>>, vector<1x32x16xf32>
    %2 = vector.broadcast %1 : vector<1x32x16xf32> to vector<2x32x16xf32>
    %3 = arith.addf %0, %2 : vector<2x32x16xf32>
    %c0_5 = arith.constant 0 : index
    %c0_6 = arith.constant 0 : index
    %c0_7 = arith.constant 0 : index
    %4 = vector.load %arg5[%c0_5, %c0_6, %c0_7] : memref<2x32x16xf32, #tpu.memory_space<vmem>>, vector<2x32x16xf32>
    tpu.vector_store %arg5[%c0_5, %c0_6, %c0_7], %3 {strides = array<i32>} : memref<2x32x16xf32, #tpu.memory_space<vmem>>, vector<2x32x16xf32>,
    return
  }
  func.func @transform_0(%arg0: i32, %arg1: i32, %arg2: i32) -> (i32, i32, i32) {
    %c0_i32 = arith.constant 0 : i32
    return %arg2, %arg1, %arg0 : i32, i32, i32
  }
  func.func @transform_1(%arg0: i32, %arg1: i32, %arg2: i32) -> (i32, i32, i32) {
    %c0_i32 = arith.constant 0 : i32
    %c0_i32_0 = arith.constant 0 : i32
    return %c0_i32, %arg1, %arg0 : i32, i32, i32
  }
  func.func @transform_2(%arg0: i32, %arg1: i32, %arg2: i32) -> (i32, i32, i32) {
    %c0_i32 = arith.constant 0 : i32
    return %arg2, %arg1, %arg0 : i32, i32, i32
  }
}

</mosaic_0001>

<bundles_post_ra>
// kernel: tpu_custom_call.1
= control target key start
LH: loop header
LB: loop body
LE: loop exit
PB: predicated region body
PF: predicated region fallthrough
CT: control target
= control target key end

     0   :  { %vm31_vm0 = vcmask 130048   ;;  %s127_s0 = inlined_call_operand.vmem [shape: f32[2,32,16], index: 0, kind: input, shape index: {}]   ;;  %s128_s1 = inlined_call_operand.vmem [shape: f32[1,32,16], index: 1, kind: input, shape index: {}]   ;;  %s129_s2 = inlined_call_operand.vmem [shape: f32[2,32,16], index: 2, kind: output, shape index: {}]  }
   0x1   :  { %v11_v0 = vld [vmem:[%s127_s0] sm:$0xff]  ;;  %v12_v2 = vld [vmem:[%s127_s0 + $0x8] sm:$0xff]  ;;  %v13_v5 = vld [vmem:[%s127_s0 + $0x10] sm:$0xff] }
   0x2   :  { %v19_v1 = vld [vmem:[%s128_s1] sm:$0xff]  ;;  %v20_v4 = vld [vmem:[%s128_s1 + $0x8] sm:$0xff]  ;;  %v21_v6 = vld [vmem:[%s128_s1 + $0x10] sm:$0xff] }
   0x3   :  { %v23_v3 = vadd.f32 %v19_v1, %v11_v0  ;;  %v24_v7 = vadd.f32 %v20_v4, %v12_v2  ;;  %v25_v8 = vadd.f32 %v21_v6, %v13_v5  ;;  %v14_v9 = vld [vmem:[%s127_s0 + $0x18] sm:$0xff]  ;;  %v15_v11 = vld [vmem:[%s127_s0 + $0x20] sm:$0xff]  ;;  %v16_v14 = vld [vmem:[%s127_s0 + $0x28] sm:$0xff] }
   0x4   :  { %v22_v10 = vld [vmem:[%s128_s1 + $0x18] sm:$0xff]  ;;  %v27_v13 = vadd.f32 %v19_v1, %v15_v11  ;;  %v17_v15 = vld [vmem:[%s127_s0 + $0x30] sm:$0xff]  ;;  %v28_v17 = vadd.f32 %v20_v4, %v16_v14 }
   0x5   :  { %32 = vst.msk [vmem:[%s129_s2] sm:$0xff] %vm31_vm0, %v23_v3  ;;  %v26_v12 = vadd.f32 %v22_v10, %v14_v9  ;;  %v18_v16 = vld [vmem:[%s127_s0 + $0x38] sm:$0xff]  ;;  %33 = vst.msk [vmem:[%s129_s2 + $0x8] sm:$0xff] %vm31_vm0, %v24_v7  ;;  %v29_v18 = vadd.f32 %v21_v6, %v17_v15 }
   0x6   :  { %34 = vst.msk [vmem:[%s129_s2 + $0x10] sm:$0xff] %vm31_vm0, %v25_v8  ;;  %v30_v19 = vadd.f32 %v22_v10, %v18_v16  ;;  %36 = vst.msk [vmem:[%s129_s2 + $0x20] sm:$0xff] %vm31_vm0, %v27_v13 }
   0x7   :  { %35 = vst.msk [vmem:[%s129_s2 + $0x18] sm:$0xff] %vm31_vm0, %v26_v12  ;;  %37 = vst.msk [vmem:[%s129_s2 + $0x28] sm:$0xff] %vm31_vm0, %v28_v17 }
   0x8   :  { %38 = vst.msk [vmem:[%s129_s2 + $0x30] sm:$0xff] %vm31_vm0, %v29_v18  ;;  %39 = vst.msk [vmem:[%s129_s2 + $0x38] sm:$0xff] %vm31_vm0, %v30_v19 }

</bundles_post_ra>
